<compile_context>
chip_gen: v6e
topology: v6e:2x2x1
jax: 0.10.0
libtpu: 0.0.40
codegen_flags: <defaults>
</compile_context>

<pallas_src>
import jax
import jax.numpy as jnp
from jax import lax
from jax.experimental import pallas as pl
from jax.experimental.pallas import tpu as pltpu


# ---------------------------------------------------------------------------
# Fused kernel: one-hot MXU embedding lookup + (identity decoder) + epilogue
# ---------------------------------------------------------------------------
def decode_embed_kernel(idx_ref, w_ref, o_ref):
    # idx_ref : VMEM (TM, 1) int32       — token indices for this row tile
    # w_ref   : VMEM (num_tokens, E) f32 — full codebook (resident, 1-buffered)
    # o_ref   : VMEM (TM, E) f32         — one row tile of the flattened output
    tm = o_ref.shape[0]
    num_tokens = w_ref.shape[0]

    # one_hot(img_seq).float() @ embedding.weight, vectorized on the MXU.
    idx = idx_ref[...]                                            # (TM, 1)
    token_iota = lax.broadcasted_iota(jnp.int32, (tm, num_tokens), 1)
    one_hot = (idx == token_iota).astype(jnp.float32)             # (TM, NT)
    z = jnp.dot(one_hot, w_ref[...], preferred_element_type=jnp.float32)

    # TODO(synk): self.model.decode(z) (external VQGAN decoder) -> identity here.
    # Fused epilogue, single lane-dense store.
    o_ref[...] = (jnp.clip(z, -1.0, 1.0) + 1.0) * 0.5


def embed_gather_decode(img_seq, codebook, *, block_rows=256):
    # img_seq : (B, N) int token indices
    # codebook: (num_tokens, E) f32 embedding weight
    b, n = img_seq.shape
    num_tokens, embed_dim = codebook.shape
    total = b * n                               # collapse B*N into one row dim
    tm = min(block_rows, total)
    assert total % tm == 0, "B*N must be divisible by the row-tile size"
    assert embed_dim % 128 == 0, "embed_dim must be lane-dense (multiple of 128)"
    idx2d = img_seq.astype(jnp.int32).reshape(total, 1)

    z2d = pl.pallas_call(
        decode_embed_kernel,
        out_shape=jax.ShapeDtypeStruct((total, embed_dim), jnp.float32),
        grid_spec=pltpu.PrefetchScalarGridSpec(
            num_scalar_prefetch=0,
            grid=(total // tm,),
            in_specs=[
                # Per-tile index column (tiny VMEM block, enables the
                # vectorized one-hot path; no SMEM capacity concerns).
                pl.BlockSpec((tm, 1), lambda t: (t, 0)),
                # Full codebook resident in VMEM; constant index map, so a
                # single buffer suffices (halves its footprint on v7x).
                pl.BlockSpec((num_tokens, embed_dim), lambda t: (0, 0),
                             pipeline_mode=pl.Buffered(1)),
            ],
            out_specs=pl.BlockSpec((tm, embed_dim), lambda t: (t, 0)),
        ),
        compiler_params=pltpu.CompilerParams(
            dimension_semantics=("parallel",),
        ),
    )(idx2d, codebook)
    return z2d.reshape(b, n, embed_dim)


# ---------------------------------------------------------------------------
# VQGanVAE.decode equivalent
# ---------------------------------------------------------------------------
def vqgan_decode(img_seq, codebook):
    b, n = img_seq.shape
    h = int(round(n ** 0.5))
    assert h * h == n, "sequence length must be a perfect square (n = h*w)"
    # z = one_hot(img_seq) @ embedding.weight, decoder (identity) and
    # (clamp(-1,1)+1)*0.5 all fused into one kernel; the clamp is elementwise,
    # so applying it before the rearrange is equivalent.
    z = embed_gather_decode(img_seq, codebook)           # (B, N, E)
    # rearrange 'b (h w) c -> b c h w' stays in plain JAX (single transpose).
    z = z.reshape(b, h, h, codebook.shape[1])
    img = jnp.transpose(z, (0, 3, 1, 2))                 # (B, C, H, W)
    return img


if __name__ == "__main__":
    key = jax.random.PRNGKey(0)
    k_idx, k_w = jax.random.split(key)

    # Small, module-consistent shapes (production VQGAN: embed_dim >= 128,
    # n_embed a multiple of 256; grid = 2 so v7x's second core has work).
    batch = 2
    fmap_size = 16                       # attn_resolutions[0]
    seq_len = fmap_size * fmap_size      # n = h * w = 256
    num_tokens = 512                     # n_embed
    embed_dim = 128                      # embed_dim (lane-dense output)

    img_seq = jax.random.randint(k_idx, (batch, seq_len), 0, num_tokens,
                                 dtype=jnp.int32)
    codebook = jax.random.normal(k_w, (num_tokens, embed_dim),
                                 dtype=jnp.float32) * 0.02

    out = vqgan_decode(img_seq, codebook)
    out = jax.block_until_ready(out)

    # Pure-JAX reference of the exact same semantics.
    one_hot = jax.nn.one_hot(img_seq, num_tokens, dtype=jnp.float32)
    z_ref = one_hot @ codebook
    z_ref = jnp.transpose(
        z_ref.reshape(batch, fmap_size, fmap_size, embed_dim), (0, 3, 1, 2))
    ref = (jnp.clip(z_ref, -1.0, 1.0) + 1.0) * 0.5

    assert out.shape == (batch, embed_dim, fmap_size, fmap_size)
    assert jnp.max(jnp.abs(out - ref)) < 1e-5

    print("KERNEL_OK")
</pallas_src>

<mosaic_0001>
module attributes {stable_mosaic.version = 11 : i64} {
  func.func @decode_embed_kernel(%arg0: i32, %arg1: memref<256x1xi32, #tpu.memory_space<vmem>>, %arg2: memref<512x128xf32, #tpu.memory_space<vmem>>, %arg3: memref<256x128xf32, #tpu.memory_space<vmem>>) attributes {dimension_semantics = [#tpu.dimension_semantics<parallel>], iteration_bounds = array<i64: 2>, scalar_prefetch = 0 : i64, scratch_operands = 0 : i64, tpu.core_type = #tpu.core_type<tc>, window_params = [{transform_indices = @transform_0, window_bounds = array<i64: 256, 1>}, {pipeline_mode = #tpu.pipeline_mode<synchronous>, transform_indices = @transform_1, window_bounds = array<i64: 512, 128>}, {transform_indices = @transform_2, window_bounds = array<i64: 256, 128>}]} {
    %c0 = arith.constant 0 : index
    %c0_0 = arith.constant 0 : index
    %0 = vector.load %arg1[%c0, %c0_0] : memref<256x1xi32, #tpu.memory_space<vmem>>, vector<256x1xi32>
    %1 = tpu.iota {dimensions = array<i32: 1>} : vector<256x512xi32>
    %2 = vector.broadcast %0 : vector<256x1xi32> to vector<256x512xi32>
    %3 = arith.cmpi eq, %2, %1 : vector<256x512xi32>
    %4 = arith.extui %3 : vector<256x512xi1> to vector<256x512xi32>
    %5 = arith.sitofp %4 : vector<256x512xi32> to vector<256x512xf32>
    %c0_1 = arith.constant 0 : index
    %c0_2 = arith.constant 0 : index
    %6 = vector.load %arg2[%c0_1, %c0_2] : memref<512x128xf32, #tpu.memory_space<vmem>>, vector<512x128xf32>
    %cst = arith.constant dense<0.000000e+00> : vector<256x128xf32>
    %7 = tpu.matmul %5, %6, %cst {dimension_numbers = #tpu.dot_dimension_numbers<[1], [0], [0], [1], [0, 0, 1, 1], [], []>} : vector<256x512xf32>, vector<512x128xf32>, vector<256x128xf32> -> vector<256x128xf32>
    %cst_3 = arith.constant -1.000000e+00 : f32
    %cst_4 = arith.constant 1.000000e+00 : f32
    %8 = vector.broadcast %cst_3 : f32 to vector<256x128xf32>
    %9 = arith.maximumf %8, %7 : vector<256x128xf32>
    %10 = vector.broadcast %cst_4 : f32 to vector<256x128xf32>
    %11 = arith.minimumf %10, %9 : vector<256x128xf32>
    %cst_5 = arith.constant 1.000000e+00 : f32
    %12 = vector.broadcast %cst_5 : f32 to vector<256x128xf32>
    %13 = arith.addf %11, %12 : vector<256x128xf32>
    %cst_6 = arith.constant 5.000000e-01 : f32
    %14 = vector.broadcast %cst_6 : f32 to vector<256x128xf32>
    %15 = arith.mulf %13, %14 : vector<256x128xf32>
    %c0_7 = arith.constant 0 : index
    %c0_8 = arith.constant 0 : index
    %16 = vector.load %arg3[%c0_7, %c0_8] : memref<256x128xf32, #tpu.memory_space<vmem>>, vector<256x128xf32>
    tpu.vector_store %arg3[%c0_7, %c0_8], %15 {strides = array<i32>} : memref<256x128xf32, #tpu.memory_space<vmem>>, vector<256x128xf32>,
    return
  }
  func.func @transform_0(%arg0: i32) -> (i32, i32) {
    %c0_i32 = arith.constant 0 : i32
    %c0_i32_0 = arith.constant 0 : i32
    return %arg0, %c0_i32 : i32, i32
  }
  func.func @transform_1(%arg0: i32) -> (i32, i32) {
    %c0_i32 = arith.constant 0 : i32
    %c0_i32_0 = arith.constant 0 : i32
    %c0_i32_1 = arith.constant 0 : i32
    return %c0_i32, %c0_i32_0 : i32, i32
  }
  func.func @transform_2(%arg0: i32) -> (i32, i32) {
    %c0_i32 = arith.constant 0 : i32
    %c0_i32_0 = arith.constant 0 : i32
    return %arg0, %c0_i32 : i32, i32
  }
}

</mosaic_0001>

<bundles_post_ra>
// kernel: tpu_custom_call.1
= control target key start
LH: loop header
LB: loop body
LE: loop exit
PB: predicated region body
PF: predicated region fallthrough
CT: control target
= control target key end

     0   :  { %7 = vsyncpa [#allocation3], 0  ;;  %s2539_s0 = inlined_call_operand.vmem [shape: s32[512,1], index: 0, kind: input, shape index: {}]   ;;  %s2540_s1 = inlined_call_operand.vmem [shape: f32[512,128], index: 1, kind: input, shape index: {}]   ;;  %s2541_s2 = inlined_call_operand.hbm [shape: f32[512,128], index: 2, kind: output, shape index: {}]  }
   0x1   :  { %9 = vsyncpa [#allocation3 + $0x1], 0  ;;  %s1842_s9 = smov 0   ;;  %s1844_s10 = smov 0  }
   0x2   :  { %s1846_s11 = smov 0   ;;  %s1848_s12 = smov 0  }
   0x3 LB: > { %s1863_s13 = sadd.s32 4294967295, %s1819_s12   ;;  %s1412_s14 = sadd.s32 4294967294, %s1819_s12   ;;  %s1819_s12 = sphi %s1848_s12, %s2547_s12   ;;  %s1815_s11 = sphi %s1846_s11, %s2546_s11   ;;  %s1811_s10 = sphi %s1844_s10, %s2545_s10   ;;  %s1807_s9 = sphi %s1842_s9, %s2544_s9  }
   0x4   : > { %s1867_s15 = sadd.s32 1, %s1819_s12   ;;  %s69_s16 = sadd.s32 1, %s1815_s11 }
   0x5   : > { %s66_s17 = ssub.s32 %s1819_s12, %s1867_s15  ;;  %p79_p0 = scmp.ne.s32.totalorder %s1815_s11, %s1811_s10 }
   0x6   : > { %p67_p1 = scmp.eq.s32.totalorder %s66_s17, 0  ;;  %p80_p2 = scmp.eq.s32.totalorder %s1863_s13, 1 }
   0x7   : > { %p85_p3 = scmp.ne.s32.totalorder %s1811_s10, %s1807_s9  ;;  %p86_p4 = scmp.eq.s32.totalorder %s1412_s14, 1 }
   0x8   : > { %s1878_s18 = scalar_select %p67_p1, %s1815_s11, %s69_s16  }
   0x9   : > { %p1880_p5 = por %p80_p2, %p79_p0  ;;  %p1884_p6 = por %p86_p4, %p85_p3 }
   0xa   : > { %p1415_p7 = scmp.ge.s32.totalorder %s1819_s12, 1  ;;  %p116_p8 = scmp.lt.s32.totalorder %s1819_s12, 3 }
   0xc   : > { %p117_p9 = pnand %p1415_p7, %p116_p8 }
   0xd   : > { %s1417_s21 = sshll.u32 (!%p117_p9), %s1863_s13, 5  ;;  %s135_s25 = sand.u32 (!%p117_p9), 1, %s1811_s10  }
   0xe   : > { %120 = sbr.rel (%p117_p9) target bundleno = 492 (0x1ec), region = 28  ;;  %p139_p10 = scmp.lt.s32.totalorder (!%p117_p9), %s1417_s21, 63 }
   0xf   : > { %s1416_s26 = sshll.u32 (!%p117_p9), %s135_s25, 8  ;;  %s1712_s28 = sshll.u32 (!%p117_p9), %s1863_s13, 12 }
  0x10   : > { %s2454_s27 = scalar_lea.vmem (!%p117_p9), [#allocation2], %s1416_s26  ;;  %s2492_s4 = scalar_lea.hbm (!%p117_p9), %s2541_s2, %s1712_s28 }
  0x11   : > { %s1350_s29 = sshll.u32 (!%p117_p9), %s2454_s27, 4  ;;  %s2499_s5 = scalar_lea.sflag (!%p117_p9), [#allocation3], %s135_s25  ;;  %s2494_s29 = int_to_ptr.vmem [resolvable:$true] %s1350_s29 }
  0x12   : > { %s1824_s13 = smov (!%p117_p9), [#allocation2]  }
  0x13   : > { %v677_v0 = vld [vmem:[%s2540_s1 + $0x78] sm:$0xff]  ;;  %v1821_v2 = vmov 0   ;;  %v1822_v3 = vmov 0.0   ;;  %v676_v4 = vld [vmem:[%s2540_s1 + $0x70] sm:$0xff]  ;;  %s2549_s21 = smov (!%p139_p10, %s1417_s21), 63  ;;  %v675_v6 = vld [vmem:[%s2540_s1 + $0x68] sm:$0xff] }
  0x14   : > { %v709_v1 = vld [vmem:[%s2540_s1 + $0x178] sm:$0xff]  ;;  %1758 = vset.pattern.permute.xlu1 %v1821_v2  ;;  %1757 = vset.pattern.permute.xlu0 %v1821_v2  ;;  %v708_v5 = vld [vmem:[%s2540_s1 + $0x170] sm:$0xff]  ;;  %v707_v7 = vld [vmem:[%s2540_s1 + $0x168] sm:$0xff]  ;;  %s1418_s6 = sshll.u32 %s2549_s21, 3  ;;  %s1763_s7 = sshll.u32 %s1824_s13, 4  ;;  %s1764_s7 = int_to_ptr.vmem [resolvable:$false] %s1763_s7 }
  0x15   : > { %726 = vmatprep.subr.mxu0 %v1822_v3  ;;  %951 = vmatprep.subr.mxu1 %v1822_v3  ;;  %s1916_s14 = scalar_lea.vmem %s2539_s0, %s1418_s6  ;;  %v674_v8 = vld [vmem:[%s2540_s1 + $0x60] sm:$0xff]  ;;  %v673_v14 = vld [vmem:[%s2540_s1 + $0x58] sm:$0xff]  ;;  %v672_v16 = vld [vmem:[%s2540_s1 + $0x50] sm:$0xff]  ;;  %s1759_s6 = scalar_lea.vmem %s2494_s29, 4096 }
  0x16   : > { %727 = vmatpush1.msra.mxu0 %v677_v0  ;;  %952 = vmatpush1.msra.mxu1 %v709_v1  ;;  %v147_v9 = vld [vmem:[%s1916_s14 + $0x10] sm:$0xff]  ;;  %v145_v10 = vld [vmem:[%s1916_s14] sm:$0xff]  ;;  %v148_v12 = vld [vmem:[%s1916_s14 + $0x18] sm:$0xff]  ;;  %p1760_p11 = scmp.ne.s32.totalorder %s2494_s29, %s1759_s6  ;;  %s1765_s8 = scalar_lea.vmem %s1764_s7, 8192 }
  0x17   : > { %728 = vmatprep.subr.mxu0 %v1822_v3  ;;  %953 = vmatprep.subr.mxu1 %v1822_v3  ;;  %v706_v11 = vld [vmem:[%s2540_s1 + $0x160] sm:$0xff]  ;;  %v146_v13 = vld [vmem:[%s1916_s14 + $0x8] sm:$0xff]  ;;  %v705_v15 = vld [vmem:[%s2540_s1 + $0x158] sm:$0xff]  ;;  %p1766_p0 = scmp.lt.s32.totalorder %s2494_s29, %s1764_s7  ;;  %p1767_p1 = scmp.lt.s32.totalorder %s1765_s8, %s1759_s6 }
  0x18   : > { %729 = vmatpush1.msra.mxu0 %v676_v4  ;;  %954 = vmatpush1.msra.mxu1 %v708_v5  ;;  %v704_v17 = vld [vmem:[%s2540_s1 + $0x150] sm:$0xff]  ;;  %v150_v18 = vld [vmem:[%s1916_s14 + $0x28] sm:$0xff]  ;;  %v149_v19 = vld [vmem:[%s1916_s14 + $0x20] sm:$0xff]  ;;  %p1761_p12 = pnand %p1760_p11, %p1880_p5 }
  0x19   : > { %730 = vmatprep.subr.mxu0 %v1822_v3  ;;  %955 = vmatprep.subr.mxu1 %v1822_v3  ;;  %v671_v20 = vld [vmem:[%s2540_s1 + $0x48] sm:$0xff]  ;;  %v152_v22 = vld [vmem:[%s1916_s14 + $0x38] sm:$0xff]  ;;  %v151_v23 = vld [vmem:[%s1916_s14 + $0x30] sm:$0xff]  ;;  %p1768_p2 = por %p1767_p1, %p1766_p0 }
  0x1a   : > { %731 = vmatpush1.msra.mxu0 %v675_v6  ;;  %956 = vmatpush1.msra.mxu1 %v707_v7  ;;  %v703_v21 = vld [vmem:[%s2540_s1 + $0x148] sm:$0xff]  ;;  %v670_v24 = vld [vmem:[%s2540_s1 + $0x40] sm:$0xff]  ;;  %v669_v26 = vld [vmem:[%s2540_s1 + $0x38] sm:$0xff]  ;;  %p1762_p13 = pneg %p1761_p12 }
  0x1b   : > { %189 = vperm.xlu1 %1758, %v147_v9   ;;  %183 = vperm.xlu0 %1757, %v145_v10   ;;  %v702_v25 = vld [vmem:[%s2540_s1 + $0x140] sm:$0xff]  ;;  %v701_v27 = vld [vmem:[%s2540_s1 + $0x138] sm:$0xff]  ;;  %v154_v28 = vld [vmem:[%s1916_s14 + $0x48] sm:$0xff] }
  0x1c   : > { %732 = vmatprep.subr.mxu0 %v1822_v3  ;;  %957 = vmatprep.subr.mxu1 %v1822_v3  ;;  %v153_v29 = vld [vmem:[%s1916_s14 + $0x40] sm:$0xff]  ;;  %v668_v30 = vld [vmem:[%s2540_s1 + $0x30] sm:$0xff]  ;;  %v156_v32 = vld [vmem:[%s1916_s14 + $0x58] sm:$0xff]  ;;  %p1769_p3 = pnand %p1768_p2, %p1762_p13 }
  0x1d   : > { %733 = vmatpush1.msra.mxu0 %v674_v8  ;;  %958 = vmatpush1.msra.mxu1 %v706_v11  ;;  %v700_v31 = vld [vmem:[%s2540_s1 + $0x130] sm:$0xff]  ;;  %v667_v34 = vld [vmem:[%s2540_s1 + $0x28] sm:$0xff]  ;;  %v666_v36 = vld [vmem:[%s2540_s1 + $0x20] sm:$0xff] }
  0x1e   : > { %734 = vmatprep.subr.mxu0 %v1822_v3  ;;  %959 = vmatprep.subr.mxu1 %v1822_v3  ;;  %v155_v33 = vld [vmem:[%s1916_s14 + $0x50] sm:$0xff]  ;;  %v699_v35 = vld [vmem:[%s2540_s1 + $0x128] sm:$0xff]  ;;  %v698_v37 = vld [vmem:[%s2540_s1 + $0x120] sm:$0xff] }
  0x1f   : > { %192 = vperm.xlu1 %1758, %v148_v12   ;;  %186 = vperm.xlu0 %1757, %v146_v13   ;;  %v158_v38 = vld [vmem:[%s1916_s14 + $0x68] sm:$0xff]  ;;  %v157_v39 = vld [vmem:[%s1916_s14 + $0x60] sm:$0xff]  ;;  %v665_v40 = vld [vmem:[%s2540_s1 + $0x18] sm:$0xff] }
  0x20   : > { %735 = vmatpush1.msra.mxu0 %v673_v14  ;;  %960 = vmatpush1.msra.mxu1 %v705_v15  ;;  %v697_v41 = vld [vmem:[%s2540_s1 + $0x118] sm:$0xff]  ;;  %v159_v43 = vld [vmem:[%s1916_s14 + $0x70] sm:$0xff]  ;;  %v663_v46 = vld [vmem:[%s2540_s1 + $0x8] sm:$0xff] }
  0x21   : > { %736 = vmatprep.subr.mxu0 %v1822_v3  ;;  %961 = vmatprep.subr.mxu1 %v1822_v3  ;;  %v160_v42 = vld [vmem:[%s1916_s14 + $0x78] sm:$0xff]  ;;  %v664_v44 = vld [vmem:[%s2540_s1 + $0x10] sm:$0xff]  ;;  %v695_v47 = vld [vmem:[%s2540_s1 + $0x108] sm:$0xff] }
  0x22   : > { %737 = vmatpush1.msra.mxu0 %v672_v16  ;;  %962 = vmatpush1.msra.mxu1 %v704_v17  ;;  %v696_v45 = vld [vmem:[%s2540_s1 + $0x110] sm:$0xff]  ;;  %v162_v48 = vld [vmem:[%s1916_s14 + $0x88] sm:$0xff]  ;;  %v161_v49 = vld [vmem:[%s1916_s14 + $0x80] sm:$0xff] }
  0x23   : > { %198 = vperm.xlu1 %1758, %v150_v18   ;;  %195 = vperm.xlu0 %1757, %v149_v19   ;;  %v662_v50 = vld [vmem:[%s2540_s1] sm:$0xff]  ;;  %v164_v52 = vld [vmem:[%s1916_s14 + $0x98] sm:$0xff]  ;;  %v163_v53 = vld [vmem:[%s1916_s14 + $0x90] sm:$0xff] }
  0x24   : > { %738 = vmatprep.subr.mxu0 %v1822_v3  ;;  %963 = vmatprep.subr.mxu1 %v1822_v3  ;;  %v694_v51 = vld [vmem:[%s2540_s1 + $0x100] sm:$0xff]  ;;  %v693_v54 = vld [vmem:[%s2540_s1 + $0xf8] sm:$0xff]  ;;  %v692_v56 = vld [vmem:[%s2540_s1 + $0xf0] sm:$0xff] }
  0x25   : > { %739 = vmatpush1.msra.mxu0 %v671_v20  ;;  %964 = vmatpush1.msra.mxu1 %v703_v21  ;;  %v725_v55 = vld [vmem:[%s2540_s1 + $0x1f8] sm:$0xff]  ;;  %v724_v57 = vld [vmem:[%s2540_s1 + $0x1f0] sm:$0xff]  ;;  %v166_v58 = vld [vmem:[%s1916_s14 + $0xa8] sm:$0xff] }
  0x26   : > { %740 = vmatprep.subr.mxu0 %v1822_v3  ;;  %965 = vmatprep.subr.mxu1 %v1822_v3  ;;  %v165_v59 = vld [vmem:[%s1916_s14 + $0xa0] sm:$0xff]  ;;  %v691_v60 = vld [vmem:[%s2540_s1 + $0xe8] sm:$0xff]  ;;  %v168_v62 = vld [vmem:[%s1916_s14 + $0xb8] sm:$0xff] }
  0x27   : > { %204 = vperm.xlu1 %1758, %v152_v22   ;;  %201 = vperm.xlu0 %1757, %v151_v23   ;;  %v723_v61 = vld [vmem:[%s2540_s1 + $0x1e8] sm:$0xff]  ;;  %v167_v63 = vld [vmem:[%s1916_s14 + $0xb0] sm:$0xff]  ;;  %v690_v0 = vld [vmem:[%s2540_s1 + $0xe0] sm:$0xff] }
  0x28   : > { %741 = vmatpush1.msra.mxu0 %v670_v24  ;;  %966 = vmatpush1.msra.mxu1 %v702_v25  ;;  %v722_v1 = vld [vmem:[%s2540_s1 + $0x1e0] sm:$0xff]  ;;  %v689_v2 = vld [vmem:[%s2540_s1 + $0xd8] sm:$0xff]  ;;  %v170_v5 = vld [vmem:[%s1916_s14 + $0xc8] sm:$0xff] }
  0x29   : > { %742 = vmatprep.subr.mxu0 %v1822_v3  ;;  %967 = vmatprep.subr.mxu1 %v1822_v3  ;;  %v721_v4 = vld [vmem:[%s2540_s1 + $0x1d8] sm:$0xff]  ;;  %v169_v6 = vld [vmem:[%s1916_s14 + $0xc0] sm:$0xff]  ;;  %v688_v7 = vld [vmem:[%s2540_s1 + $0xd0] sm:$0xff] }
  0x2a   : > { %743 = vmatpush1.msra.mxu0 %v669_v26  ;;  %968 = vmatpush1.msra.mxu1 %v701_v27  ;;  %v720_v8 = vld [vmem:[%s2540_s1 + $0x1d0] sm:$0xff]  ;;  %v172_v9 = vld [vmem:[%s1916_s14 + $0xd8] sm:$0xff]  ;;  %v687_v11 = vld [vmem:[%s2540_s1 + $0xc8] sm:$0xff] }
  0x2b   : > { %210 = vperm.xlu1 %1758, %v154_v28   ;;  %207 = vperm.xlu0 %1757, %v153_v29   ;;  %v171_v10 = vld [vmem:[%s1916_s14 + $0xd0] sm:$0xff]  ;;  %v719_v12 = vld [vmem:[%s2540_s1 + $0x1c8] sm:$0xff]  ;;  %v686_v13 = vld [vmem:[%s2540_s1 + $0xc0] sm:$0xff] }
  0x2c   : > { %744 = vmatprep.subr.mxu0 %v1822_v3  ;;  %969 = vmatprep.subr.mxu1 %v1822_v3  ;;  %v718_v14 = vld [vmem:[%s2540_s1 + $0x1c0] sm:$0xff]  ;;  %v174_v15 = vld [vmem:[%s1916_s14 + $0xe8] sm:$0xff]  ;;  %v685_v17 = vld [vmem:[%s2540_s1 + $0xb8] sm:$0xff] }
  0x2d   : > { %745 = vmatpush1.msra.mxu0 %v668_v30  ;;  %970 = vmatpush1.msra.mxu1 %v700_v31  ;;  %v173_v16 = vld [vmem:[%s1916_s14 + $0xe0] sm:$0xff]  ;;  %v717_v18 = vld [vmem:[%s2540_s1 + $0x1b8] sm:$0xff]  ;;  %v175_v20 = vld [vmem:[%s1916_s14 + $0xf0] sm:$0xff] }
  0x2e   : > { %746 = vmatprep.subr.mxu0 %v1822_v3  ;;  %971 = vmatprep.subr.mxu1 %v1822_v3  ;;  %v176_v19 = vld [vmem:[%s1916_s14 + $0xf8] sm:$0xff]  ;;  %v684_v21 = vld [vmem:[%s2540_s1 + $0xb0] sm:$0xff]  ;;  %v683_v23 = vld [vmem:[%s2540_s1 + $0xa8] sm:$0xff] }
  0x2f   : > { %216 = vperm.xlu1 %1758, %v156_v32   ;;  %213 = vperm.xlu0 %1757, %v155_v33   ;;  %v716_v22 = vld [vmem:[%s2540_s1 + $0x1b0] sm:$0xff]  ;;  %v715_v24 = vld [vmem:[%s2540_s1 + $0x1a8] sm:$0xff]  ;;  %v682_v25 = vld [vmem:[%s2540_s1 + $0xa0] sm:$0xff] }
  0x30   : > { %747 = vmatpush1.msra.mxu0 %v667_v34  ;;  %972 = vmatpush1.msra.mxu1 %v699_v35  ;;  %v714_v26 = vld [vmem:[%s2540_s1 + $0x1a0] sm:$0xff]  ;;  %v681_v27 = vld [vmem:[%s2540_s1 + $0x98] sm:$0xff]  ;;  %v680_v29 = vld [vmem:[%s2540_s1 + $0x90] sm:$0xff]  ;;  %v177_v35 = vlaneseq }
  0x31   : > { %748 = vmatprep.subr.mxu0 %v1822_v3  ;;  %973 = vmatprep.subr.mxu1 %v1822_v3  ;;  %v713_v28 = vld [vmem:[%s2540_s1 + $0x198] sm:$0xff]  ;;  %v712_v30 = vld [vmem:[%s2540_s1 + $0x190] sm:$0xff]  ;;  %v679_v31 = vld [vmem:[%s2540_s1 + $0x88] sm:$0xff] }
  0x32   : > { %749 = vmatpush1.msra.mxu0 %v666_v36  ;;  %974 = vmatpush1.msra.mxu1 %v698_v37  ;;  %v711_v32 = vld [vmem:[%s2540_s1 + $0x188] sm:$0xff]  ;;  %v678_v33 = vld [vmem:[%s2540_s1 + $0x80] sm:$0xff]  ;;  %v2184_v36 = vand.u32 127, %v177_v35 }
  0x33   : > { %222 = vperm.xlu1 %1758, %v158_v38   ;;  %219 = vperm.xlu0 %1757, %v157_v39   ;;  %v710_v34 = vld [vmem:[%s2540_s1 + $0x180] sm:$0xff] }
  0x34   : > { %750 = vmatprep.subr.mxu0 %v1822_v3  ;;  %975 = vmatprep.subr.mxu1 %v1822_v3  ;;  %v2187_v37 = vadd.s32 128, %v2184_v36  ;;  %v2190_v38 = vadd.s32 384, %v2184_v36  ;;  %v2193_v39 = vadd.s32 256, %v2184_v36 }
  0x35   : > { %751 = vmatpush1.msra.mxu0 %v665_v40  ;;  %976 = vmatpush1.msra.mxu1 %v697_v41 }
  0x36   : > { %752 = vmatprep.subr.mxu0 %v1822_v3  ;;  %977 = vmatprep.subr.mxu1 %v1822_v3 }
  0x37   : > { %228 = vperm.xlu1 %1758, %v160_v42   ;;  %225 = vperm.xlu0 %1757, %v159_v43  }
  0x38   : > { %753 = vmatpush1.msra.mxu0 %v664_v44  ;;  %978 = vmatpush1.msra.mxu1 %v696_v45 }
  0x39   : > { %754 = vmatprep.subr.mxu0 %v1822_v3  ;;  %979 = vmatprep.subr.mxu1 %v1822_v3 }
  0x3a   : > { %755 = vmatpush1.msra.mxu0 %v663_v46  ;;  %980 = vmatpush1.msra.mxu1 %v695_v47 }
  0x3b   : > { %234 = vperm.xlu1 %1758, %v162_v48   ;;  %231 = vperm.xlu0 %1757, %v161_v49  }
  0x3c   : > { %756 = vmatprep.subr.mxu0 %v1822_v3  ;;  %981 = vmatprep.subr.mxu1 %v1822_v3 }
  0x3d   : > { %757 = vmatpush1.msra.mxu0 %v662_v50  ;;  %982 = vmatpush1.msra.mxu1 %v694_v51 }
  0x3e   : > { %758 = vmatprep.subr.mxu0 %v1822_v3  ;;  %983 = vmatprep.subr.mxu1 %v1822_v3 }
  0x3f   : > { %240 = vperm.xlu1 %1758, %v164_v52   ;;  %237 = vperm.xlu0 %1757, %v163_v53  }
  0x40   : > { %759 = vmatpush2.msra.mxu0 %v693_v54  ;;  %984 = vmatpush2.msra.mxu1 %v725_v55 }
  0x41   : > { %760 = vmatprep.subr.mxu0 %v1822_v3  ;;  %985 = vmatprep.subr.mxu1 %v1822_v3 }
  0x42   : > { %761 = vmatpush2.msra.mxu0 %v692_v56  ;;  %986 = vmatpush2.msra.mxu1 %v724_v57 }
  0x43   : > { %246 = vperm.xlu1 %1758, %v166_v58   ;;  %243 = vperm.xlu0 %1757, %v165_v59  }
  0x44   : > { %762 = vmatprep.subr.mxu0 %v1822_v3  ;;  %987 = vmatprep.subr.mxu1 %v1822_v3 }
  0x45   : > { %763 = vmatpush2.msra.mxu0 %v691_v60  ;;  %988 = vmatpush2.msra.mxu1 %v723_v61 }
  0x46   : > { %764 = vmatprep.subr.mxu0 %v1822_v3  ;;  %989 = vmatprep.subr.mxu1 %v1822_v3 }
  0x47   : > { %252 = vperm.xlu1 %1758, %v168_v62   ;;  %249 = vperm.xlu0 %1757, %v167_v63  }
  0x48   : > { %765 = vmatpush2.msra.mxu0 %v690_v0  ;;  %990 = vmatpush2.msra.mxu1 %v722_v1 }
  0x49   : > { %766 = vmatprep.subr.mxu0 %v1822_v3  ;;  %991 = vmatprep.subr.mxu1 %v1822_v3 }
  0x4a   : > { %767 = vmatpush2.msra.mxu0 %v689_v2  ;;  %992 = vmatpush2.msra.mxu1 %v721_v4 }
  0x4b   : > { %258 = vperm.xlu1 %1758, %v170_v5   ;;  %255 = vperm.xlu0 %1757, %v169_v6  }
  0x4c   : > { %768 = vmatprep.subr.mxu0 %v1822_v3  ;;  %993 = vmatprep.subr.mxu1 %v1822_v3 }
  0x4d   : > { %769 = vmatpush2.msra.mxu0 %v688_v7  ;;  %994 = vmatpush2.msra.mxu1 %v720_v8 }
  0x4e   : > { %770 = vmatprep.subr.mxu0 %v1822_v3  ;;  %995 = vmatprep.subr.mxu1 %v1822_v3 }
  0x4f   : > { %264 = vperm.xlu1 %1758, %v172_v9   ;;  %261 = vperm.xlu0 %1757, %v171_v10  }
  0x50   : > { %771 = vmatpush2.msra.mxu0 %v687_v11  ;;  %996 = vmatpush2.msra.mxu1 %v719_v12 }
  0x51   : > { %772 = vmatprep.subr.mxu0 %v1822_v3  ;;  %997 = vmatprep.subr.mxu1 %v1822_v3 }
  0x52   : > { %773 = vmatpush2.msra.mxu0 %v686_v13  ;;  %998 = vmatpush2.msra.mxu1 %v718_v14 }
  0x53   : > { %270 = vperm.xlu1 %1758, %v174_v15   ;;  %267 = vperm.xlu0 %1757, %v173_v16  }
  0x54   : > { %774 = vmatprep.subr.mxu0 %v1822_v3  ;;  %999 = vmatprep.subr.mxu1 %v1822_v3 }
  0x55   : > { %775 = vmatpush2.msra.mxu0 %v685_v17  ;;  %1000 = vmatpush2.msra.mxu1 %v717_v18 }
  0x56   : > { %776 = vmatprep.subr.mxu0 %v1822_v3  ;;  %1001 = vmatprep.subr.mxu1 %v1822_v3 }
  0x57   : > { %276 = vperm.xlu1 %1758, %v176_v19   ;;  %273 = vperm.xlu0 %1757, %v175_v20  }
  0x58   : > { %777 = vmatpush2.msra.mxu0 %v684_v21  ;;  %1002 = vmatpush2.msra.mxu1 %v716_v22 }
  0x59   : > { %778 = vmatprep.subr.mxu0 %v1822_v3  ;;  %1003 = vmatprep.subr.mxu1 %v1822_v3 }
  0x5a   : > { %779 = vmatpush2.msra.mxu0 %v683_v23  ;;  %1004 = vmatpush2.msra.mxu1 %v715_v24 }
  0x5b   : > { %780 = vmatprep.subr.mxu0 %v1822_v3  ;;  %1005 = vmatprep.subr.mxu1 %v1822_v3 }
  0x5c   : > { %781 = vmatpush2.msra.mxu0 %v682_v25  ;;  %1006 = vmatpush2.msra.mxu1 %v714_v26 }
  0x5d   : > { %782 = vmatprep.subr.mxu0 %v1822_v3  ;;  %1007 = vmatprep.subr.mxu1 %v1822_v3 }
  0x5e   : > { %783 = vmatpush2.msra.mxu0 %v681_v27  ;;  %1008 = vmatpush2.msra.mxu1 %v713_v28 }
  0x5f   : > { %784 = vmatprep.subr.mxu0 %v1822_v3  ;;  %1009 = vmatprep.subr.mxu1 %v1822_v3 }
  0x60   : > { %785 = vmatpush2.msra.mxu0 %v680_v29  ;;  %1010 = vmatpush2.msra.mxu1 %v712_v30 }
  0x61   : > { %786 = vmatprep.subr.mxu0 %v1822_v3  ;;  %1011 = vmatprep.subr.mxu1 %v1822_v3 }
  0x62   : > { %787 = vmatpush2.msra.mxu0 %v679_v31  ;;  %1012 = vmatpush2.msra.mxu1 %v711_v32 }
  0x63   : > { %788 = vmatprep.subr.mxu0 %v1822_v3  ;;  %1013 = vmatprep.subr.mxu1 %v1822_v3  ;;  %v1823_v3 = vmov 1.0  }
  0x64   : > { %789 = vmatpush2.msra.mxu0 %v678_v33  ;;  %1014 = vmatpush2.msra.mxu1 %v710_v34 }
  0x96   : > { %v184_v40 = vpop.permute.xlu0 %183  ;;  %v190_v41 = vpop.permute.xlu1 %189 }
  0x97   : > { %vm279_vm0 = vcmp.eq.s32.totalorder %v184_v40, %v2187_v37  ;;  %vm281_vm1 = vcmp.eq.s32.totalorder %v184_v40, %v2190_v38  ;;  %vm278_vm2 = vcmp.eq.s32.totalorder %v184_v40, %v2184_v36  ;;  %vm280_vm3 = vcmp.eq.s32.totalorder %v184_v40, %v2193_v39 }
  0x98   : > { %1547 = vmatprep.mubr.msk.f32.mxu0 %vm279_vm0, %v1823_v3  ;;  %1611 = vmatprep.mubr.msk.f32.mxu1 %vm281_vm1, %v1823_v3  ;;  %vm287_vm4 = vcmp.eq.s32.totalorder %v190_v41, %v2187_v37  ;;  %vm289_vm5 = vcmp.eq.s32.totalorder %v190_v41, %v2190_v38  ;;  %vm286_vm10 = vcmp.eq.s32.totalorder %v190_v41, %v2184_v36 }
  0x99   : > { %1548 = vmatmul.mubr.msk.f32.vlgmr.msra.gmra.mxu0 %vm278_vm2, %v1823_v3  ;;  %1612 = vmatmul.mubr.msk.f32.vlgmr.msra.gmra.mxu1 %vm280_vm3, %v1823_v3  ;;  %vm288_vm11 = vcmp.eq.s32.totalorder %v190_v41, %v2193_v39 }
  0x9a   : > { %v187_v42 = vpop.permute.xlu0 %186  ;;  %v193_v43 = vpop.permute.xlu1 %192 }
  0x9b   : > { %vm283_vm6 = vcmp.eq.s32.totalorder %v187_v42, %v2187_v37  ;;  %vm285_vm7 = vcmp.eq.s32.totalorder %v187_v42, %v2190_v38  ;;  %vm282_vm8 = vcmp.eq.s32.totalorder %v187_v42, %v2184_v36  ;;  %vm284_vm9 = vcmp.eq.s32.totalorder %v187_v42, %v2193_v39 }
  0x9c   : > { %1549 = vmatprep.mubr.msk.f32.mxu0 %vm283_vm6, %v1823_v3  ;;  %1613 = vmatprep.mubr.msk.f32.mxu1 %vm285_vm7, %v1823_v3  ;;  %vm291_vm12 = vcmp.eq.s32.totalorder %v193_v43, %v2187_v37  ;;  %vm293_vm13 = vcmp.eq.s32.totalorder %v193_v43, %v2190_v38  ;;  %vm290_vm14 = vcmp.eq.s32.totalorder %v193_v43, %v2184_v36 }
  0x9d   : > { %1550 = vmatmul.mubr.msk.f32.gmra.mxu0 %vm282_vm8, %v1823_v3  ;;  %1614 = vmatmul.mubr.msk.f32.gmra.mxu1 %vm284_vm9, %v1823_v3  ;;  %vm292_vm15 = vcmp.eq.s32.totalorder %v193_v43, %v2193_v39 }
  0x9e   : > { %1551 = vmatprep.mubr.msk.f32.mxu0 %vm287_vm4, %v1823_v3  ;;  %1615 = vmatprep.mubr.msk.f32.mxu1 %vm289_vm5, %v1823_v3  ;;  %v196_v44 = vpop.permute.xlu0 %195  ;;  %v199_v45 = vpop.permute.xlu1 %198 }
  0x9f   : > { %vm295_vm0 = vcmp.eq.s32.totalorder %v196_v44, %v2187_v37  ;;  %vm297_vm1 = vcmp.eq.s32.totalorder %v196_v44, %v2190_v38  ;;  %vm294_vm2 = vcmp.eq.s32.totalorder %v196_v44, %v2184_v36  ;;  %vm296_vm3 = vcmp.eq.s32.totalorder %v196_v44, %v2193_v39 }
  0xa0   : > { %vm299_vm4 = vcmp.eq.s32.totalorder %v199_v45, %v2187_v37  ;;  %vm301_vm5 = vcmp.eq.s32.totalorder %v199_v45, %v2190_v38  ;;  %vm298_vm6 = vcmp.eq.s32.totalorder %v199_v45, %v2184_v36  ;;  %vm300_vm7 = vcmp.eq.s32.totalorder %v199_v45, %v2193_v39 }
  0xa1   : > { %1552 = vmatmul.mubr.msk.f32.gmra.mxu0 %vm286_vm10, %v1823_v3  ;;  %1616 = vmatmul.mubr.msk.f32.gmra.mxu1 %vm288_vm11, %v1823_v3 }
  0xa2   : > { %1553 = vmatprep.mubr.msk.f32.mxu0 %vm291_vm12, %v1823_v3  ;;  %1617 = vmatprep.mubr.msk.f32.mxu1 %vm293_vm13, %v1823_v3  ;;  %v202_v46 = vpop.permute.xlu0 %201  ;;  %v205_v47 = vpop.permute.xlu1 %204 }
  0xa3   : > { %vm303_vm8 = vcmp.eq.s32.totalorder %v202_v46, %v2187_v37  ;;  %vm305_vm9 = vcmp.eq.s32.totalorder %v202_v46, %v2190_v38  ;;  %vm302_vm10 = vcmp.eq.s32.totalorder %v202_v46, %v2184_v36  ;;  %vm304_vm11 = vcmp.eq.s32.totalorder %v202_v46, %v2193_v39 }
  0xa4   : > { %vm307_vm12 = vcmp.eq.s32.totalorder %v205_v47, %v2187_v37  ;;  %vm309_vm13 = vcmp.eq.s32.totalorder %v205_v47, %v2190_v38 }
  0xa5   : > { %1554 = vmatmul.mubr.msk.f32.gmra.mxu0 %vm290_vm14, %v1823_v3  ;;  %1618 = vmatmul.mubr.msk.f32.gmra.mxu1 %vm292_vm15, %v1823_v3  ;;  %vm306_vm14 = vcmp.eq.s32.totalorder %v205_v47, %v2184_v36  ;;  %vm308_vm15 = vcmp.eq.s32.totalorder %v205_v47, %v2193_v39 }
  0xa6   : > { %1555 = vmatprep.mubr.msk.f32.mxu0 %vm295_vm0, %v1823_v3  ;;  %1619 = vmatprep.mubr.msk.f32.mxu1 %vm297_vm1, %v1823_v3  ;;  %v208_v48 = vpop.permute.xlu0 %207  ;;  %v211_v49 = vpop.permute.xlu1 %210 }
  0xa7   : > { %vm311_vm0 = vcmp.eq.s32.totalorder %v208_v48, %v2187_v37  ;;  %vm313_vm1 = vcmp.eq.s32.totalorder %v208_v48, %v2190_v38 }
  0xa9   : > { %1556 = vmatmul.mubr.msk.f32.gmra.mxu0 %vm294_vm2, %v1823_v3  ;;  %1620 = vmatmul.mubr.msk.f32.gmra.mxu1 %vm296_vm3, %v1823_v3  ;;  %vm310_vm2 = vcmp.eq.s32.totalorder %v208_v48, %v2184_v36  ;;  %vm312_vm3 = vcmp.eq.s32.totalorder %v208_v48, %v2193_v39 }
  0xaa   : > { %1557 = vmatprep.mubr.msk.f32.mxu0 %vm299_vm4, %v1823_v3  ;;  %1621 = vmatprep.mubr.msk.f32.mxu1 %vm301_vm5, %v1823_v3  ;;  %vm315_vm4 = vcmp.eq.s32.totalorder %v211_v49, %v2187_v37  ;;  %vm317_vm5 = vcmp.eq.s32.totalorder %v211_v49, %v2190_v38  ;;  %v214_v50 = vpop.permute.xlu0 %213  ;;  %v217_v51 = vpop.permute.xlu1 %216 }
  0xad   : > { %1558 = vmatmul.mubr.msk.f32.gmra.mxu0 %vm298_vm6, %v1823_v3  ;;  %1622 = vmatmul.mubr.msk.f32.gmra.mxu1 %vm300_vm7, %v1823_v3  ;;  %vm314_vm6 = vcmp.eq.s32.totalorder %v211_v49, %v2184_v36  ;;  %vm316_vm7 = vcmp.eq.s32.totalorder %v211_v49, %v2193_v39 }
  0xae   : > { %1559 = vmatprep.mubr.msk.f32.mxu0 %vm303_vm8, %v1823_v3  ;;  %1623 = vmatprep.mubr.msk.f32.mxu1 %vm305_vm9, %v1823_v3  ;;  %vm319_vm8 = vcmp.eq.s32.totalorder %v214_v50, %v2187_v37  ;;  %vm321_vm9 = vcmp.eq.s32.totalorder %v214_v50, %v2190_v38  ;;  %v220_v52 = vpop.permute.xlu0 %219  ;;  %v223_v53 = vpop.permute.xlu1 %222 }
  0xb1   : > { %1560 = vmatmul.mubr.msk.f32.gmra.mxu0 %vm302_vm10, %v1823_v3  ;;  %1624 = vmatmul.mubr.msk.f32.gmra.mxu1 %vm304_vm11, %v1823_v3  ;;  %vm318_vm10 = vcmp.eq.s32.totalorder %v214_v50, %v2184_v36  ;;  %vm320_vm11 = vcmp.eq.s32.totalorder %v214_v50, %v2193_v39 }
  0xb2   : > { %1561 = vmatprep.mubr.msk.f32.mxu0 %vm307_vm12, %v1823_v3  ;;  %1625 = vmatprep.mubr.msk.f32.mxu1 %vm309_vm13, %v1823_v3  ;;  %vm323_vm12 = vcmp.eq.s32.totalorder %v217_v51, %v2187_v37  ;;  %vm325_vm13 = vcmp.eq.s32.totalorder %v217_v51, %v2190_v38  ;;  %v226_v54 = vpop.permute.xlu0 %225  ;;  %v229_v55 = vpop.permute.xlu1 %228 }
  0xb5   : > { %1562 = vmatmul.mubr.msk.f32.gmra.mxu0 %vm306_vm14, %v1823_v3  ;;  %1626 = vmatmul.mubr.msk.f32.gmra.mxu1 %vm308_vm15, %v1823_v3  ;;  %vm322_vm14 = vcmp.eq.s32.totalorder %v217_v51, %v2184_v36  ;;  %vm324_vm15 = vcmp.eq.s32.totalorder %v217_v51, %v2193_v39 }
  0xb6   : > { %1563 = vmatprep.mubr.msk.f32.mxu0 %vm311_vm0, %v1823_v3  ;;  %1627 = vmatprep.mubr.msk.f32.mxu1 %vm313_vm1, %v1823_v3  ;;  %vm327_vm0 = vcmp.eq.s32.totalorder %v220_v52, %v2187_v37  ;;  %vm329_vm1 = vcmp.eq.s32.totalorder %v220_v52, %v2190_v38  ;;  %v232_v56 = vpop.permute.xlu0 %231  ;;  %v235_v57 = vpop.permute.xlu1 %234 }
  0xb9   : > { %1564 = vmatmul.mubr.msk.f32.gmra.mxu0 %vm310_vm2, %v1823_v3  ;;  %1628 = vmatmul.mubr.msk.f32.gmra.mxu1 %vm312_vm3, %v1823_v3  ;;  %vm326_vm2 = vcmp.eq.s32.totalorder %v220_v52, %v2184_v36  ;;  %vm328_vm3 = vcmp.eq.s32.totalorder %v220_v52, %v2193_v39 }
  0xba   : > { %1565 = vmatprep.mubr.msk.f32.mxu0 %vm315_vm4, %v1823_v3  ;;  %1629 = vmatprep.mubr.msk.f32.mxu1 %vm317_vm5, %v1823_v3  ;;  %vm331_vm4 = vcmp.eq.s32.totalorder %v223_v53, %v2187_v37  ;;  %vm333_vm5 = vcmp.eq.s32.totalorder %v223_v53, %v2190_v38  ;;  %v238_v58 = vpop.permute.xlu0 %237  ;;  %v241_v59 = vpop.permute.xlu1 %240 }
  0xbd   : > { %1566 = vmatmul.mubr.msk.f32.gmra.mxu0 %vm314_vm6, %v1823_v3  ;;  %1630 = vmatmul.mubr.msk.f32.gmra.mxu1 %vm316_vm7, %v1823_v3  ;;  %vm330_vm6 = vcmp.eq.s32.totalorder %v223_v53, %v2184_v36  ;;  %vm332_vm7 = vcmp.eq.s32.totalorder %v223_v53, %v2193_v39 }
  0xbe   : > { %1567 = vmatprep.mubr.msk.f32.mxu0 %vm319_vm8, %v1823_v3  ;;  %1631 = vmatprep.mubr.msk.f32.mxu1 %vm321_vm9, %v1823_v3  ;;  %vm335_vm8 = vcmp.eq.s32.totalorder %v226_v54, %v2187_v37  ;;  %vm337_vm9 = vcmp.eq.s32.totalorder %v226_v54, %v2190_v38  ;;  %v244_v60 = vpop.permute.xlu0 %243  ;;  %v247_v61 = vpop.permute.xlu1 %246 }
  0xc1   : > { %1568 = vmatmul.mubr.msk.f32.gmra.mxu0 %vm318_vm10, %v1823_v3  ;;  %1632 = vmatmul.mubr.msk.f32.gmra.mxu1 %vm320_vm11, %v1823_v3  ;;  %vm334_vm10 = vcmp.eq.s32.totalorder %v226_v54, %v2184_v36  ;;  %vm336_vm11 = vcmp.eq.s32.totalorder %v226_v54, %v2193_v39 }
  0xc2   : > { %1569 = vmatprep.mubr.msk.f32.mxu0 %vm323_vm12, %v1823_v3  ;;  %1633 = vmatprep.mubr.msk.f32.mxu1 %vm325_vm13, %v1823_v3  ;;  %vm339_vm12 = vcmp.eq.s32.totalorder %v229_v55, %v2187_v37  ;;  %vm341_vm13 = vcmp.eq.s32.totalorder %v229_v55, %v2190_v38  ;;  %v250_v62 = vpop.permute.xlu0 %249  ;;  %v253_v63 = vpop.permute.xlu1 %252 }
  0xc5   : > { %1570 = vmatmul.mubr.msk.f32.gmra.mxu0 %vm322_vm14, %v1823_v3  ;;  %1634 = vmatmul.mubr.msk.f32.gmra.mxu1 %vm324_vm15, %v1823_v3  ;;  %vm338_vm14 = vcmp.eq.s32.totalorder %v229_v55, %v2184_v36  ;;  %vm340_vm15 = vcmp.eq.s32.totalorder %v229_v55, %v2193_v39 }
  0xc6   : > { %1571 = vmatprep.mubr.msk.f32.mxu0 %vm327_vm0, %v1823_v3  ;;  %1635 = vmatprep.mubr.msk.f32.mxu1 %vm329_vm1, %v1823_v3  ;;  %vm343_vm0 = vcmp.eq.s32.totalorder %v232_v56, %v2187_v37  ;;  %vm345_vm1 = vcmp.eq.s32.totalorder %v232_v56, %v2190_v38  ;;  %v256_v0 = vpop.permute.xlu0 %255  ;;  %v259_v1 = vpop.permute.xlu1 %258 }
  0xc9   : > { %1572 = vmatmul.mubr.msk.f32.gmra.mxu0 %vm326_vm2, %v1823_v3  ;;  %1636 = vmatmul.mubr.msk.f32.gmra.mxu1 %vm328_vm3, %v1823_v3  ;;  %vm342_vm2 = vcmp.eq.s32.totalorder %v232_v56, %v2184_v36  ;;  %vm344_vm3 = vcmp.eq.s32.totalorder %v232_v56, %v2193_v39 }
  0xca   : > { %1573 = vmatprep.mubr.msk.f32.mxu0 %vm331_vm4, %v1823_v3  ;;  %1637 = vmatprep.mubr.msk.f32.mxu1 %vm333_vm5, %v1823_v3  ;;  %vm347_vm4 = vcmp.eq.s32.totalorder %v235_v57, %v2187_v37  ;;  %vm349_vm5 = vcmp.eq.s32.totalorder %v235_v57, %v2190_v38  ;;  %v262_v2 = vpop.permute.xlu0 %261  ;;  %v265_v4 = vpop.permute.xlu1 %264 }
  0xcd   : > { %1574 = vmatmul.mubr.msk.f32.gmra.mxu0 %vm330_vm6, %v1823_v3  ;;  %1638 = vmatmul.mubr.msk.f32.gmra.mxu1 %vm332_vm7, %v1823_v3  ;;  %vm346_vm6 = vcmp.eq.s32.totalorder %v235_v57, %v2184_v36  ;;  %vm348_vm7 = vcmp.eq.s32.totalorder %v235_v57, %v2193_v39 }
  0xce   : > { %1575 = vmatprep.mubr.msk.f32.mxu0 %vm335_vm8, %v1823_v3  ;;  %1639 = vmatprep.mubr.msk.f32.mxu1 %vm337_vm9, %v1823_v3  ;;  %vm351_vm8 = vcmp.eq.s32.totalorder %v238_v58, %v2187_v37  ;;  %vm353_vm9 = vcmp.eq.s32.totalorder %v238_v58, %v2190_v38  ;;  %v268_v5 = vpop.permute.xlu0 %267  ;;  %v271_v6 = vpop.permute.xlu1 %270 }
  0xd1   : > { %1576 = vmatmul.mubr.msk.f32.gmra.mxu0 %vm334_vm10, %v1823_v3  ;;  %1640 = vmatmul.mubr.msk.f32.gmra.mxu1 %vm336_vm11, %v1823_v3  ;;  %vm350_vm10 = vcmp.eq.s32.totalorder %v238_v58, %v2184_v36  ;;  %vm352_vm11 = vcmp.eq.s32.totalorder %v238_v58, %v2193_v39 }
  0xd2   : > { %1577 = vmatprep.mubr.msk.f32.mxu0 %vm339_vm12, %v1823_v3  ;;  %1641 = vmatprep.mubr.msk.f32.mxu1 %vm341_vm13, %v1823_v3  ;;  %vm355_vm12 = vcmp.eq.s32.totalorder %v241_v59, %v2187_v37  ;;  %vm357_vm13 = vcmp.eq.s32.totalorder %v241_v59, %v2190_v38  ;;  %v274_v7 = vpop.permute.xlu0 %273  ;;  %v277_v8 = vpop.permute.xlu1 %276 }
  0xd5   : > { %1578 = vmatmul.mubr.msk.f32.gmra.mxu0 %vm338_vm14, %v1823_v3  ;;  %1642 = vmatmul.mubr.msk.f32.gmra.mxu1 %vm340_vm15, %v1823_v3  ;;  %vm354_vm14 = vcmp.eq.s32.totalorder %v241_v59, %v2184_v36  ;;  %vm356_vm15 = vcmp.eq.s32.totalorder %v241_v59, %v2193_v39 }
  0xd6   : > { %1579 = vmatprep.mubr.msk.f32.mxu0 %vm343_vm0, %v1823_v3  ;;  %1643 = vmatprep.mubr.msk.f32.mxu1 %vm345_vm1, %v1823_v3  ;;  %vm359_vm0 = vcmp.eq.s32.totalorder %v244_v60, %v2187_v37  ;;  %vm361_vm1 = vcmp.eq.s32.totalorder %v244_v60, %v2190_v38 }
  0xd9   : > { %1580 = vmatmul.mubr.msk.f32.gmra.mxu0 %vm342_vm2, %v1823_v3  ;;  %1644 = vmatmul.mubr.msk.f32.gmra.mxu1 %vm344_vm3, %v1823_v3  ;;  %vm358_vm2 = vcmp.eq.s32.totalorder %v244_v60, %v2184_v36  ;;  %vm360_vm3 = vcmp.eq.s32.totalorder %v244_v60, %v2193_v39 }
  0xda   : > { %1581 = vmatprep.mubr.msk.f32.mxu0 %vm347_vm4, %v1823_v3  ;;  %1645 = vmatprep.mubr.msk.f32.mxu1 %vm349_vm5, %v1823_v3  ;;  %vm363_vm4 = vcmp.eq.s32.totalorder %v247_v61, %v2187_v37  ;;  %vm365_vm5 = vcmp.eq.s32.totalorder %v247_v61, %v2190_v38 }
  0xdd   : > { %1582 = vmatmul.mubr.msk.f32.gmra.mxu0 %vm346_vm6, %v1823_v3  ;;  %1646 = vmatmul.mubr.msk.f32.gmra.mxu1 %vm348_vm7, %v1823_v3  ;;  %vm362_vm6 = vcmp.eq.s32.totalorder %v247_v61, %v2184_v36  ;;  %vm364_vm7 = vcmp.eq.s32.totalorder %v247_v61, %v2193_v39 }
  0xde   : > { %1583 = vmatprep.mubr.msk.f32.mxu0 %vm351_vm8, %v1823_v3  ;;  %1647 = vmatprep.mubr.msk.f32.mxu1 %vm353_vm9, %v1823_v3  ;;  %vm367_vm8 = vcmp.eq.s32.totalorder %v250_v62, %v2187_v37  ;;  %vm369_vm9 = vcmp.eq.s32.totalorder %v250_v62, %v2190_v38 }
  0xe1   : > { %1584 = vmatmul.mubr.msk.f32.gmra.mxu0 %vm350_vm10, %v1823_v3  ;;  %1648 = vmatmul.mubr.msk.f32.gmra.mxu1 %vm352_vm11, %v1823_v3  ;;  %vm366_vm10 = vcmp.eq.s32.totalorder %v250_v62, %v2184_v36  ;;  %vm368_vm11 = vcmp.eq.s32.totalorder %v250_v62, %v2193_v39 }
  0xe2   : > { %1585 = vmatprep.mubr.msk.f32.mxu0 %vm355_vm12, %v1823_v3  ;;  %1649 = vmatprep.mubr.msk.f32.mxu1 %vm357_vm13, %v1823_v3  ;;  %vm371_vm12 = vcmp.eq.s32.totalorder %v253_v63, %v2187_v37  ;;  %vm373_vm13 = vcmp.eq.s32.totalorder %v253_v63, %v2190_v38 }
  0xe5   : > { %1586 = vmatmul.mubr.msk.f32.gmra.mxu0 %vm354_vm14, %v1823_v3  ;;  %1650 = vmatmul.mubr.msk.f32.gmra.mxu1 %vm356_vm15, %v1823_v3  ;;  %vm370_vm14 = vcmp.eq.s32.totalorder %v253_v63, %v2184_v36  ;;  %vm372_vm15 = vcmp.eq.s32.totalorder %v253_v63, %v2193_v39 }
  0xe6   : > { %1587 = vmatprep.mubr.msk.f32.mxu0 %vm359_vm0, %v1823_v3  ;;  %1651 = vmatprep.mubr.msk.f32.mxu1 %vm361_vm1, %v1823_v3  ;;  %vm375_vm0 = vcmp.eq.s32.totalorder %v256_v0, %v2187_v37  ;;  %vm377_vm1 = vcmp.eq.s32.totalorder %v256_v0, %v2190_v38 }
  0xe9   : > { %1588 = vmatmul.mubr.msk.f32.gmra.mxu0 %vm358_vm2, %v1823_v3  ;;  %1652 = vmatmul.mubr.msk.f32.gmra.mxu1 %vm360_vm3, %v1823_v3  ;;  %vm374_vm2 = vcmp.eq.s32.totalorder %v256_v0, %v2184_v36  ;;  %vm376_vm3 = vcmp.eq.s32.totalorder %v256_v0, %v2193_v39 }
  0xea   : > { %1589 = vmatprep.mubr.msk.f32.mxu0 %vm363_vm4, %v1823_v3  ;;  %1653 = vmatprep.mubr.msk.f32.mxu1 %vm365_vm5, %v1823_v3  ;;  %vm379_vm4 = vcmp.eq.s32.totalorder %v259_v1, %v2187_v37  ;;  %vm381_vm5 = vcmp.eq.s32.totalorder %v259_v1, %v2190_v38 }
  0xed   : > { %1590 = vmatmul.mubr.msk.f32.gmra.mxu0 %vm362_vm6, %v1823_v3  ;;  %1654 = vmatmul.mubr.msk.f32.gmra.mxu1 %vm364_vm7, %v1823_v3  ;;  %vm378_vm6 = vcmp.eq.s32.totalorder %v259_v1, %v2184_v36  ;;  %vm380_vm7 = vcmp.eq.s32.totalorder %v259_v1, %v2193_v39 }
  0xee   : > { %1591 = vmatprep.mubr.msk.f32.mxu0 %vm367_vm8, %v1823_v3  ;;  %1655 = vmatprep.mubr.msk.f32.mxu1 %vm369_vm9, %v1823_v3  ;;  %vm383_vm8 = vcmp.eq.s32.totalorder %v262_v2, %v2187_v37  ;;  %vm385_vm9 = vcmp.eq.s32.totalorder %v262_v2, %v2190_v38 }
  0xf1   : > { %1592 = vmatmul.mubr.msk.f32.gmra.mxu0 %vm366_vm10, %v1823_v3  ;;  %1656 = vmatmul.mubr.msk.f32.gmra.mxu1 %vm368_vm11, %v1823_v3  ;;  %vm382_vm10 = vcmp.eq.s32.totalorder %v262_v2, %v2184_v36  ;;  %vm384_vm11 = vcmp.eq.s32.totalorder %v262_v2, %v2193_v39 }
  0xf2   : > { %1593 = vmatprep.mubr.msk.f32.mxu0 %vm371_vm12, %v1823_v3  ;;  %1657 = vmatprep.mubr.msk.f32.mxu1 %vm373_vm13, %v1823_v3  ;;  %vm387_vm12 = vcmp.eq.s32.totalorder %v265_v4, %v2187_v37  ;;  %vm389_vm13 = vcmp.eq.s32.totalorder %v265_v4, %v2190_v38 }
  0xf5   : > { %1594 = vmatmul.mubr.msk.f32.gmra.mxu0 %vm370_vm14, %v1823_v3  ;;  %1658 = vmatmul.mubr.msk.f32.gmra.mxu1 %vm372_vm15, %v1823_v3  ;;  %vm386_vm14 = vcmp.eq.s32.totalorder %v265_v4, %v2184_v36  ;;  %vm388_vm15 = vcmp.eq.s32.totalorder %v265_v4, %v2193_v39 }
  0xf6   : > { %1595 = vmatprep.mubr.msk.f32.mxu0 %vm375_vm0, %v1823_v3  ;;  %1659 = vmatprep.mubr.msk.f32.mxu1 %vm377_vm1, %v1823_v3  ;;  %vm391_vm0 = vcmp.eq.s32.totalorder %v268_v5, %v2187_v37  ;;  %vm393_vm1 = vcmp.eq.s32.totalorder %v268_v5, %v2190_v38 }
  0xf9   : > { %1596 = vmatmul.mubr.msk.f32.gmra.mxu0 %vm374_vm2, %v1823_v3  ;;  %1660 = vmatmul.mubr.msk.f32.gmra.mxu1 %vm376_vm3, %v1823_v3  ;;  %vm390_vm2 = vcmp.eq.s32.totalorder %v268_v5, %v2184_v36  ;;  %vm392_vm3 = vcmp.eq.s32.totalorder %v268_v5, %v2193_v39 }
  0xfa   : > { %1597 = vmatprep.mubr.msk.f32.mxu0 %vm379_vm4, %v1823_v3  ;;  %1661 = vmatprep.mubr.msk.f32.mxu1 %vm381_vm5, %v1823_v3  ;;  %vm395_vm4 = vcmp.eq.s32.totalorder %v271_v6, %v2187_v37  ;;  %vm397_vm5 = vcmp.eq.s32.totalorder %v271_v6, %v2190_v38 }
  0xfd   : > { %1598 = vmatmul.mubr.msk.f32.gmra.mxu0 %vm378_vm6, %v1823_v3  ;;  %1662 = vmatmul.mubr.msk.f32.gmra.mxu1 %vm380_vm7, %v1823_v3  ;;  %vm394_vm6 = vcmp.eq.s32.totalorder %v271_v6, %v2184_v36  ;;  %vm396_vm7 = vcmp.eq.s32.totalorder %v271_v6, %v2193_v39 }
  0xfe   : > { %1599 = vmatprep.mubr.msk.f32.mxu0 %vm383_vm8, %v1823_v3  ;;  %1663 = vmatprep.mubr.msk.f32.mxu1 %vm385_vm9, %v1823_v3  ;;  %vm399_vm8 = vcmp.eq.s32.totalorder %v274_v7, %v2187_v37  ;;  %vm401_vm9 = vcmp.eq.s32.totalorder %v274_v7, %v2190_v38 }
 0x101   : > { %1600 = vmatmul.mubr.msk.f32.gmra.mxu0 %vm382_vm10, %v1823_v3  ;;  %1664 = vmatmul.mubr.msk.f32.gmra.mxu1 %vm384_vm11, %v1823_v3  ;;  %vm398_vm10 = vcmp.eq.s32.totalorder %v274_v7, %v2184_v36  ;;  %vm400_vm11 = vcmp.eq.s32.totalorder %v274_v7, %v2193_v39 }
 0x102   : > { %1601 = vmatprep.mubr.msk.f32.mxu0 %vm387_vm12, %v1823_v3  ;;  %1665 = vmatprep.mubr.msk.f32.mxu1 %vm389_vm13, %v1823_v3  ;;  %vm403_vm12 = vcmp.eq.s32.totalorder %v277_v8, %v2187_v37  ;;  %vm405_vm13 = vcmp.eq.s32.totalorder %v277_v8, %v2190_v38 }
 0x105   : > { %1602 = vmatmul.mubr.msk.f32.gmra.mxu0 %vm386_vm14, %v1823_v3  ;;  %1666 = vmatmul.mubr.msk.f32.gmra.mxu1 %vm388_vm15, %v1823_v3  ;;  %vm402_vm14 = vcmp.eq.s32.totalorder %v277_v8, %v2184_v36  ;;  %vm404_vm15 = vcmp.eq.s32.totalorder %v277_v8, %v2193_v39 }
 0x106   : > { %1603 = vmatprep.mubr.msk.f32.mxu0 %vm391_vm0, %v1823_v3  ;;  %1667 = vmatprep.mubr.msk.f32.mxu1 %vm393_vm1, %v1823_v3 }
 0x109   : > { %1604 = vmatmul.mubr.msk.f32.gmra.mxu0 %vm390_vm2, %v1823_v3  ;;  %1668 = vmatmul.mubr.msk.f32.gmra.mxu1 %vm392_vm3, %v1823_v3 }
 0x10a   : > { %1605 = vmatprep.mubr.msk.f32.mxu0 %vm395_vm4, %v1823_v3  ;;  %1669 = vmatprep.mubr.msk.f32.mxu1 %vm397_vm5, %v1823_v3 }
 0x10d   : > { %1606 = vmatmul.mubr.msk.f32.gmra.mxu0 %vm394_vm6, %v1823_v3  ;;  %1670 = vmatmul.mubr.msk.f32.gmra.mxu1 %vm396_vm7, %v1823_v3 }
 0x10e   : > { %1607 = vmatprep.mubr.msk.f32.mxu0 %vm399_vm8, %v1823_v3  ;;  %1671 = vmatprep.mubr.msk.f32.mxu1 %vm401_vm9, %v1823_v3 }
 0x111   : > { %1608 = vmatmul.mubr.msk.f32.gmra.mxu0 %vm398_vm10, %v1823_v3  ;;  %1672 = vmatmul.mubr.msk.f32.gmra.mxu1 %vm400_vm11, %v1823_v3 }
 0x112   : > { %1609 = vmatprep.mubr.msk.f32.mxu0 %vm403_vm12, %v1823_v3  ;;  %1673 = vmatprep.mubr.msk.f32.mxu1 %vm405_vm13, %v1823_v3 }
 0x115   : > { %1610 = vmatmul.mubr.msk.f32.gmra.mxu0 %vm402_vm14, %v1823_v3  ;;  %1674 = vmatmul.mubr.msk.f32.gmra.mxu1 %vm404_vm15, %v1823_v3 }
 0x159   : > { %v792_v9 = vpop.f32.mrf.mxu0  ;;  %v1017_v10 = vpop.f32.mrf.mxu1 }
 0x15a   : > { %v1018_v11 = vadd.f32 %v1017_v10, %v792_v9 }
 0x15b   : > { %v794_v12 = vpop.f32.mrf.mxu0  ;;  %v1019_v13 = vpop.f32.mrf.mxu1 }
 0x15c   : > { %v1675_v14 = vclamps-f32 %v1018_v11, 1.0 }
 0x15d   : > { %v797_v15 = vpop.f32.mrf.mxu0  ;;  %v1022_v16 = vpop.f32.mrf.mxu1 }
 0x15e   : > { %v1240_v17 = vadd.f32 1.0, %v1675_v14  ;;  %v1023_v18 = vadd.f32 %v1022_v16, %v797_v15 }
 0x15f   : > { %v799_v19 = vpop.f32.mrf.mxu0  ;;  %v1024_v20 = vpop.f32.mrf.mxu1 }
 0x160   : > { %v1272_v21 = vmul.f32 0.5, %v1240_v17  ;;  %v1676_v22 = vclamps-f32 %v1023_v18, 1.0 }
 0x161   : > { %v802_v23 = vpop.f32.mrf.mxu0  ;;  %v1027_v24 = vpop.f32.mrf.mxu1 }
 0x162   : > { %1304 = vst [vmem:[%s2454_s27] sm:$0xff] %v1272_v21  ;;  %v1241_v25 = vadd.f32 1.0, %v1676_v22  ;;  %v1028_v26 = vadd.f32 %v1027_v24, %v802_v23 }
 0x163   : > { %v804_v27 = vpop.f32.mrf.mxu0  ;;  %v1029_v28 = vpop.f32.mrf.mxu1 }
 0x164   : > { %v1273_v29 = vmul.f32 0.5, %v1241_v25  ;;  %v1677_v30 = vclamps-f32 %v1028_v26, 1.0 }
 0x165   : > { %v807_v31 = vpop.f32.mrf.mxu0  ;;  %v1032_v32 = vpop.f32.mrf.mxu1 }
 0x166   : > { %1305 = vst [vmem:[%s2454_s27 + $0x8] sm:$0xff] %v1273_v29  ;;  %v1242_v33 = vadd.f32 1.0, %v1677_v30  ;;  %v1033_v34 = vadd.f32 %v1032_v32, %v807_v31 }
 0x167   : > { %v809_v35 = vpop.f32.mrf.mxu0  ;;  %v1034_v36 = vpop.f32.mrf.mxu1 }
 0x168   : > { %v1274_v37 = vmul.f32 0.5, %v1242_v33  ;;  %v1678_v38 = vclamps-f32 %v1033_v34, 1.0 }
 0x169   : > { %v812_v39 = vpop.f32.mrf.mxu0  ;;  %v1037_v40 = vpop.f32.mrf.mxu1 }
 0x16a   : > { %1306 = vst [vmem:[%s2454_s27 + $0x10] sm:$0xff] %v1274_v37  ;;  %v1243_v3 = vadd.f32 1.0, %v1678_v38  ;;  %v1038_v41 = vadd.f32 %v1037_v40, %v812_v39 }
 0x16b   : > { %v814_v42 = vpop.f32.mrf.mxu0  ;;  %v1039_v43 = vpop.f32.mrf.mxu1 }
 0x16c   : > { %v1275_v44 = vmul.f32 0.5, %v1243_v3  ;;  %v1679_v45 = vclamps-f32 %v1038_v41, 1.0 }
 0x16d   : > { %v817_v46 = vpop.f32.mrf.mxu0  ;;  %v1042_v47 = vpop.f32.mrf.mxu1 }
 0x16e   : > { %1307 = vst [vmem:[%s2454_s27 + $0x18] sm:$0xff] %v1275_v44  ;;  %v1244_v48 = vadd.f32 1.0, %v1679_v45  ;;  %v1043_v49 = vadd.f32 %v1042_v47, %v817_v46 }
 0x16f   : > { %v819_v50 = vpop.f32.mrf.mxu0  ;;  %v1044_v51 = vpop.f32.mrf.mxu1 }
 0x170   : > { %v1276_v52 = vmul.f32 0.5, %v1244_v48  ;;  %v1680_v53 = vclamps-f32 %v1043_v49, 1.0 }
 0x171   : > { %v822_v54 = vpop.f32.mrf.mxu0  ;;  %v1047_v55 = vpop.f32.mrf.mxu1 }
 0x172   : > { %1308 = vst [vmem:[%s2454_s27 + $0x20] sm:$0xff] %v1276_v52  ;;  %v1245_v56 = vadd.f32 1.0, %v1680_v53  ;;  %v1048_v57 = vadd.f32 %v1047_v55, %v822_v54 }
 0x173   : > { %v824_v58 = vpop.f32.mrf.mxu0  ;;  %v1049_v59 = vpop.f32.mrf.mxu1 }
 0x174   : > { %v1277_v60 = vmul.f32 0.5, %v1245_v56  ;;  %v1681_v61 = vclamps-f32 %v1048_v57, 1.0 }
 0x175   : > { %v827_v62 = vpop.f32.mrf.mxu0  ;;  %v1052_v63 = vpop.f32.mrf.mxu1 }
 0x176   : > { %1309 = vst [vmem:[%s2454_s27 + $0x28] sm:$0xff] %v1277_v60  ;;  %v1246_v0 = vadd.f32 1.0, %v1681_v61  ;;  %v1053_v1 = vadd.f32 %v1052_v63, %v827_v62 }
 0x177   : > { %v829_v2 = vpop.f32.mrf.mxu0  ;;  %v1054_v4 = vpop.f32.mrf.mxu1 }
 0x178   : > { %v1278_v5 = vmul.f32 0.5, %v1246_v0  ;;  %v1682_v6 = vclamps-f32 %v1053_v1, 1.0 }
 0x179   : > { %v832_v7 = vpop.f32.mrf.mxu0  ;;  %v1057_v8 = vpop.f32.mrf.mxu1 }
 0x17a   : > { %1310 = vst [vmem:[%s2454_s27 + $0x30] sm:$0xff] %v1278_v5  ;;  %v1247_v9 = vadd.f32 1.0, %v1682_v6  ;;  %v1058_v10 = vadd.f32 %v1057_v8, %v832_v7 }
 0x17b   : > { %v834_v11 = vpop.f32.mrf.mxu0  ;;  %v1059_v12 = vpop.f32.mrf.mxu1 }
 0x17c   : > { %v1279_v13 = vmul.f32 0.5, %v1247_v9  ;;  %v1683_v14 = vclamps-f32 %v1058_v10, 1.0 }
 0x17d   : > { %v837_v15 = vpop.f32.mrf.mxu0  ;;  %v1062_v16 = vpop.f32.mrf.mxu1 }
 0x17e   : > { %1311 = vst [vmem:[%s2454_s27 + $0x38] sm:$0xff] %v1279_v13  ;;  %v1248_v17 = vadd.f32 1.0, %v1683_v14  ;;  %v1063_v18 = vadd.f32 %v1062_v16, %v837_v15 }
 0x17f   : > { %v839_v19 = vpop.f32.mrf.mxu0  ;;  %v1064_v20 = vpop.f32.mrf.mxu1 }
 0x180   : > { %v1280_v21 = vmul.f32 0.5, %v1248_v17  ;;  %v1684_v22 = vclamps-f32 %v1063_v18, 1.0 }
 0x181   : > { %v842_v23 = vpop.f32.mrf.mxu0  ;;  %v1067_v24 = vpop.f32.mrf.mxu1 }
 0x182   : > { %1312 = vst [vmem:[%s2454_s27 + $0x40] sm:$0xff] %v1280_v21  ;;  %v1249_v25 = vadd.f32 1.0, %v1684_v22  ;;  %v1068_v26 = vadd.f32 %v1067_v24, %v842_v23 }
 0x183   : > { %v844_v27 = vpop.f32.mrf.mxu0  ;;  %v1069_v28 = vpop.f32.mrf.mxu1 }
 0x184   : > { %v1281_v29 = vmul.f32 0.5, %v1249_v25  ;;  %v1685_v30 = vclamps-f32 %v1068_v26, 1.0 }
 0x185   : > { %v847_v31 = vpop.f32.mrf.mxu0  ;;  %v1072_v32 = vpop.f32.mrf.mxu1 }
 0x186   : > { %1313 = vst [vmem:[%s2454_s27 + $0x48] sm:$0xff] %v1281_v29  ;;  %v1250_v33 = vadd.f32 1.0, %v1685_v30  ;;  %v1073_v34 = vadd.f32 %v1072_v32, %v847_v31 }
 0x187   : > { %v849_v35 = vpop.f32.mrf.mxu0  ;;  %v1074_v36 = vpop.f32.mrf.mxu1 }
 0x188   : > { %v1282_v37 = vmul.f32 0.5, %v1250_v33  ;;  %v1686_v38 = vclamps-f32 %v1073_v34, 1.0 }
 0x189   : > { %v852_v39 = vpop.f32.mrf.mxu0  ;;  %v1077_v40 = vpop.f32.mrf.mxu1 }
 0x18a   : > { %1314 = vst [vmem:[%s2454_s27 + $0x50] sm:$0xff] %v1282_v37  ;;  %v1251_v3 = vadd.f32 1.0, %v1686_v38  ;;  %v1078_v41 = vadd.f32 %v1077_v40, %v852_v39 }
 0x18b   : > { %v854_v42 = vpop.f32.mrf.mxu0  ;;  %v1079_v43 = vpop.f32.mrf.mxu1 }
 0x18c   : > { %v1283_v44 = vmul.f32 0.5, %v1251_v3  ;;  %v1687_v45 = vclamps-f32 %v1078_v41, 1.0 }
 0x18d   : > { %v857_v46 = vpop.f32.mrf.mxu0  ;;  %v1082_v47 = vpop.f32.mrf.mxu1 }
 0x18e   : > { %1315 = vst [vmem:[%s2454_s27 + $0x58] sm:$0xff] %v1283_v44  ;;  %v1252_v48 = vadd.f32 1.0, %v1687_v45  ;;  %v1083_v49 = vadd.f32 %v1082_v47, %v857_v46 }
 0x18f   : > { %v859_v50 = vpop.f32.mrf.mxu0  ;;  %v1084_v51 = vpop.f32.mrf.mxu1 }
 0x190   : > { %v1284_v52 = vmul.f32 0.5, %v1252_v48  ;;  %v1688_v53 = vclamps-f32 %v1083_v49, 1.0 }
 0x191   : > { %v862_v54 = vpop.f32.mrf.mxu0  ;;  %v1087_v55 = vpop.f32.mrf.mxu1 }
 0x192   : > { %1316 = vst [vmem:[%s2454_s27 + $0x60] sm:$0xff] %v1284_v52  ;;  %v1253_v56 = vadd.f32 1.0, %v1688_v53  ;;  %v1088_v57 = vadd.f32 %v1087_v55, %v862_v54 }
 0x193   : > { %v864_v58 = vpop.f32.mrf.mxu0  ;;  %v1089_v59 = vpop.f32.mrf.mxu1 }
 0x194   : > { %v1285_v60 = vmul.f32 0.5, %v1253_v56  ;;  %v1689_v61 = vclamps-f32 %v1088_v57, 1.0 }
 0x195   : > { %v867_v62 = vpop.f32.mrf.mxu0  ;;  %v1092_v63 = vpop.f32.mrf.mxu1 }
 0x196   : > { %1317 = vst [vmem:[%s2454_s27 + $0x68] sm:$0xff] %v1285_v60  ;;  %v1254_v0 = vadd.f32 1.0, %v1689_v61  ;;  %v1093_v1 = vadd.f32 %v1092_v63, %v867_v62 }
 0x197   : > { %v869_v2 = vpop.f32.mrf.mxu0  ;;  %v1094_v4 = vpop.f32.mrf.mxu1 }
 0x198   : > { %v1286_v5 = vmul.f32 0.5, %v1254_v0  ;;  %v1690_v6 = vclamps-f32 %v1093_v1, 1.0 }
 0x199   : > { %v872_v7 = vpop.f32.mrf.mxu0  ;;  %v1097_v8 = vpop.f32.mrf.mxu1 }
 0x19a   : > { %1318 = vst [vmem:[%s2454_s27 + $0x70] sm:$0xff] %v1286_v5  ;;  %v1255_v9 = vadd.f32 1.0, %v1690_v6  ;;  %v1098_v10 = vadd.f32 %v1097_v8, %v872_v7 }
 0x19b   : > { %v874_v11 = vpop.f32.mrf.mxu0  ;;  %v1099_v12 = vpop.f32.mrf.mxu1 }
 0x19c   : > { %v1287_v13 = vmul.f32 0.5, %v1255_v9  ;;  %v1691_v14 = vclamps-f32 %v1098_v10, 1.0 }
 0x19d   : > { %v877_v15 = vpop.f32.mrf.mxu0  ;;  %v1102_v16 = vpop.f32.mrf.mxu1 }
 0x19e   : > { %1319 = vst [vmem:[%s2454_s27 + $0x78] sm:$0xff] %v1287_v13  ;;  %v1256_v17 = vadd.f32 1.0, %v1691_v14  ;;  %v1103_v18 = vadd.f32 %v1102_v16, %v877_v15 }
 0x19f   : > { %v879_v19 = vpop.f32.mrf.mxu0  ;;  %v1104_v20 = vpop.f32.mrf.mxu1 }
 0x1a0   : > { %v1288_v21 = vmul.f32 0.5, %v1256_v17  ;;  %v1692_v22 = vclamps-f32 %v1103_v18, 1.0 }
 0x1a1   : > { %v882_v23 = vpop.f32.mrf.mxu0  ;;  %v1107_v24 = vpop.f32.mrf.mxu1 }
 0x1a2   : > { %1320 = vst [vmem:[%s2454_s27 + $0x80] sm:$0xff] %v1288_v21  ;;  %v1257_v25 = vadd.f32 1.0, %v1692_v22  ;;  %v1108_v26 = vadd.f32 %v1107_v24, %v882_v23 }
 0x1a3   : > { %v884_v27 = vpop.f32.mrf.mxu0  ;;  %v1109_v28 = vpop.f32.mrf.mxu1 }
 0x1a4   : > { %v1289_v29 = vmul.f32 0.5, %v1257_v25  ;;  %v1693_v30 = vclamps-f32 %v1108_v26, 1.0 }
 0x1a5   : > { %v887_v31 = vpop.f32.mrf.mxu0  ;;  %v1112_v32 = vpop.f32.mrf.mxu1 }
 0x1a6   : > { %1321 = vst [vmem:[%s2454_s27 + $0x88] sm:$0xff] %v1289_v29  ;;  %v1258_v33 = vadd.f32 1.0, %v1693_v30  ;;  %v1113_v34 = vadd.f32 %v1112_v32, %v887_v31 }
 0x1a7   : > { %v889_v35 = vpop.f32.mrf.mxu0  ;;  %v1114_v36 = vpop.f32.mrf.mxu1 }
 0x1a8   : > { %v1290_v37 = vmul.f32 0.5, %v1258_v33  ;;  %v1694_v38 = vclamps-f32 %v1113_v34, 1.0 }
 0x1a9   : > { %v892_v39 = vpop.f32.mrf.mxu0  ;;  %v1117_v40 = vpop.f32.mrf.mxu1 }
 0x1aa   : > { %1322 = vst [vmem:[%s2454_s27 + $0x90] sm:$0xff] %v1290_v37  ;;  %v1259_v3 = vadd.f32 1.0, %v1694_v38  ;;  %v1118_v41 = vadd.f32 %v1117_v40, %v892_v39 }
 0x1ab   : > { %v894_v42 = vpop.f32.mrf.mxu0  ;;  %v1119_v43 = vpop.f32.mrf.mxu1 }
 0x1ac   : > { %v1291_v44 = vmul.f32 0.5, %v1259_v3  ;;  %v1695_v45 = vclamps-f32 %v1118_v41, 1.0 }
 0x1ad   : > { %v897_v46 = vpop.f32.mrf.mxu0  ;;  %v1122_v47 = vpop.f32.mrf.mxu1 }
 0x1ae   : > { %1323 = vst [vmem:[%s2454_s27 + $0x98] sm:$0xff] %v1291_v44  ;;  %v1260_v48 = vadd.f32 1.0, %v1695_v45  ;;  %v1123_v49 = vadd.f32 %v1122_v47, %v897_v46 }
 0x1af   : > { %v899_v50 = vpop.f32.mrf.mxu0  ;;  %v1124_v51 = vpop.f32.mrf.mxu1 }
 0x1b0   : > { %v1292_v52 = vmul.f32 0.5, %v1260_v48  ;;  %v1696_v53 = vclamps-f32 %v1123_v49, 1.0 }
 0x1b1   : > { %v902_v54 = vpop.f32.mrf.mxu0  ;;  %v1127_v55 = vpop.f32.mrf.mxu1 }
 0x1b2   : > { %1324 = vst [vmem:[%s2454_s27 + $0xa0] sm:$0xff] %v1292_v52  ;;  %v1261_v56 = vadd.f32 1.0, %v1696_v53  ;;  %v1128_v57 = vadd.f32 %v1127_v55, %v902_v54 }
 0x1b3   : > { %v904_v58 = vpop.f32.mrf.mxu0  ;;  %v1129_v59 = vpop.f32.mrf.mxu1 }
 0x1b4   : > { %v1293_v60 = vmul.f32 0.5, %v1261_v56  ;;  %v1697_v61 = vclamps-f32 %v1128_v57, 1.0 }
 0x1b5   : > { %v907_v62 = vpop.f32.mrf.mxu0  ;;  %v1132_v63 = vpop.f32.mrf.mxu1 }
 0x1b6   : > { %1325 = vst [vmem:[%s2454_s27 + $0xa8] sm:$0xff] %v1293_v60  ;;  %v1262_v0 = vadd.f32 1.0, %v1697_v61  ;;  %v1133_v1 = vadd.f32 %v1132_v63, %v907_v62 }
 0x1b7   : > { %v909_v2 = vpop.f32.mrf.mxu0  ;;  %v1134_v4 = vpop.f32.mrf.mxu1 }
 0x1b8   : > { %v1294_v5 = vmul.f32 0.5, %v1262_v0  ;;  %v1698_v6 = vclamps-f32 %v1133_v1, 1.0 }
 0x1b9   : > { %v912_v7 = vpop.f32.mrf.mxu0  ;;  %v1137_v8 = vpop.f32.mrf.mxu1 }
 0x1ba   : > { %1326 = vst [vmem:[%s2454_s27 + $0xb0] sm:$0xff] %v1294_v5  ;;  %v1263_v9 = vadd.f32 1.0, %v1698_v6  ;;  %v1138_v10 = vadd.f32 %v1137_v8, %v912_v7 }
 0x1bb   : > { %v914_v11 = vpop.f32.mrf.mxu0  ;;  %v1139_v12 = vpop.f32.mrf.mxu1 }
 0x1bc   : > { %v1295_v13 = vmul.f32 0.5, %v1263_v9  ;;  %v1699_v14 = vclamps-f32 %v1138_v10, 1.0 }
 0x1bd   : > { %v917_v15 = vpop.f32.mrf.mxu0  ;;  %v1142_v16 = vpop.f32.mrf.mxu1 }
 0x1be   : > { %1327 = vst [vmem:[%s2454_s27 + $0xb8] sm:$0xff] %v1295_v13  ;;  %v1264_v17 = vadd.f32 1.0, %v1699_v14  ;;  %v1143_v18 = vadd.f32 %v1142_v16, %v917_v15 }
 0x1bf   : > { %v919_v19 = vpop.f32.mrf.mxu0  ;;  %v1144_v20 = vpop.f32.mrf.mxu1 }
 0x1c0   : > { %v1296_v21 = vmul.f32 0.5, %v1264_v17  ;;  %v1700_v22 = vclamps-f32 %v1143_v18, 1.0 }
 0x1c1   : > { %v922_v23 = vpop.f32.mrf.mxu0  ;;  %v1147_v24 = vpop.f32.mrf.mxu1 }
 0x1c2   : > { %1328 = vst [vmem:[%s2454_s27 + $0xc0] sm:$0xff] %v1296_v21  ;;  %v1265_v25 = vadd.f32 1.0, %v1700_v22  ;;  %v1148_v26 = vadd.f32 %v1147_v24, %v922_v23 }
 0x1c3   : > { %v924_v27 = vpop.f32.mrf.mxu0  ;;  %v1149_v28 = vpop.f32.mrf.mxu1 }
 0x1c4   : > { %v1297_v29 = vmul.f32 0.5, %v1265_v25  ;;  %v1701_v30 = vclamps-f32 %v1148_v26, 1.0 }
 0x1c5   : > { %v927_v31 = vpop.f32.mrf.mxu0  ;;  %v1152_v32 = vpop.f32.mrf.mxu1 }
 0x1c6   : > { %1329 = vst [vmem:[%s2454_s27 + $0xc8] sm:$0xff] %v1297_v29  ;;  %v1266_v33 = vadd.f32 1.0, %v1701_v30  ;;  %v1153_v34 = vadd.f32 %v1152_v32, %v927_v31 }
 0x1c7   : > { %v929_v35 = vpop.f32.mrf.mxu0  ;;  %v1154_v36 = vpop.f32.mrf.mxu1 }
 0x1c8   : > { %v1298_v37 = vmul.f32 0.5, %v1266_v33  ;;  %v1702_v38 = vclamps-f32 %v1153_v34, 1.0 }
 0x1c9   : > { %v932_v39 = vpop.f32.mrf.mxu0  ;;  %v1157_v40 = vpop.f32.mrf.mxu1 }
 0x1ca   : > { %1330 = vst [vmem:[%s2454_s27 + $0xd0] sm:$0xff] %v1298_v37  ;;  %v1267_v3 = vadd.f32 1.0, %v1702_v38  ;;  %v1158_v41 = vadd.f32 %v1157_v40, %v932_v39 }
 0x1cb   : > { %v934_v42 = vpop.f32.mrf.mxu0  ;;  %v1159_v43 = vpop.f32.mrf.mxu1 }
 0x1cc   : > { %v1299_v44 = vmul.f32 0.5, %v1267_v3  ;;  %v1703_v45 = vclamps-f32 %v1158_v41, 1.0 }
 0x1cd   : > { %v937_v46 = vpop.f32.mrf.mxu0  ;;  %v1162_v47 = vpop.f32.mrf.mxu1 }
 0x1ce   : > { %1331 = vst [vmem:[%s2454_s27 + $0xd8] sm:$0xff] %v1299_v44  ;;  %v1268_v48 = vadd.f32 1.0, %v1703_v45  ;;  %v1163_v49 = vadd.f32 %v1162_v47, %v937_v46 }
 0x1cf   : > { %v939_v50 = vpop.f32.mrf.mxu0  ;;  %v1164_v51 = vpop.f32.mrf.mxu1 }
 0x1d0   : > { %v1300_v52 = vmul.f32 0.5, %v1268_v48  ;;  %v1704_v53 = vclamps-f32 %v1163_v49, 1.0 }
 0x1d1   : > { %v942_v54 = vpop.f32.mrf.mxu0  ;;  %v1167_v55 = vpop.f32.mrf.mxu1 }
 0x1d2   : > { %1332 = vst [vmem:[%s2454_s27 + $0xe0] sm:$0xff] %v1300_v52  ;;  %v1269_v56 = vadd.f32 1.0, %v1704_v53  ;;  %v1168_v57 = vadd.f32 %v1167_v55, %v942_v54 }
 0x1d3   : > { %v944_v58 = vpop.f32.mrf.mxu0  ;;  %v1169_v59 = vpop.f32.mrf.mxu1 }
 0x1d4   : > { %v1301_v60 = vmul.f32 0.5, %v1269_v56  ;;  %v1705_v61 = vclamps-f32 %v1168_v57, 1.0 }
 0x1d5   : > { %v947_v62 = vpop.f32.mrf.mxu0  ;;  %v1172_v63 = vpop.f32.mrf.mxu1 }
 0x1d6   : > { %1333 = vst [vmem:[%s2454_s27 + $0xe8] sm:$0xff] %v1301_v60  ;;  %v1270_v0 = vadd.f32 1.0, %v1705_v61  ;;  %v1173_v1 = vadd.f32 %v1172_v63, %v947_v62 }
 0x1d7   : > { %v949_v2 = vpop.f32.mrf.mxu0  ;;  %v1174_v4 = vpop.f32.mrf.mxu1 }
 0x1d8   : > { %v1302_v5 = vmul.f32 0.5, %v1270_v0  ;;  %v1706_v6 = vclamps-f32 %v1173_v1, 1.0 }
 0x1da   : > { %1334 = vst [vmem:[%s2454_s27 + $0xf0] sm:$0xff] %v1302_v5  ;;  %v1271_v7 = vadd.f32 1.0, %v1706_v6 }
 0x1dc   : > { %v1303_v8 = vmul.f32 0.5, %v1271_v7 }
 0x1de   : > { %1335 = vst [vmem:[%s2454_s27 + $0xf8] sm:$0xff] %v1303_v8 }
 0x1df   : > { %1772 = shalt.err (!%p1769_p3)
}
 0x1e0   : > { %s1773_s16 = scalar_lea.hbm %s2492_s4, 4096  ;;  %s1777_s21 = scalar_lea.hbm %s2541_s2, 8192 }
 0x1e1   : > { %p1774_p4 = scmp.ne.s32.totalorder %s2492_s4, %s1773_s16  ;;  %p1778_p9 = scmp.lt.s32.totalorder %s2492_s4, %s2541_s2 }
 0x1e2   : > { %p1779_p10 = scmp.lt.s32.totalorder %s1777_s21, %s1773_s16 }
 0x1e3   : > { %p1775_p7 = pnand %p1774_p4, %p1880_p5 }
 0x1e4   : > { %p1780_p11 = por %p1779_p10, %p1778_p9 }
 0x1e5   : > { %p1776_p8 = pneg %p1775_p7 }
 0x1e7   : > { %p1781_p12 = pnand %p1780_p11, %p1776_p8 }
 0x1e9   : > { %1784 = shalt.err (!%p1781_p12)
}
 0x1ea   : > { %s1825_s24 = smov 128   ;;  %s1826_s25 = smov 8  }
 0x1eb   : > { %1713 = dma.vmem_to_hbm [thread:$0]  (%p1880_p5), %s2494_s29, 4096, %s2492_s4, %s2499_s5, %s1825_s24, %s1825_s24, %s1826_s25  }
 0x1ec PF: > { %p1719_p13 = scmp.ge.s32.totalorder %s1819_s12, 2  ;;  %s1365_s26 = sand.u32 1, %s1807_s9  }
 0x1ed   : > { %s1366_s27 = scalar_lea.sflag [#allocation3], %s1365_s26 }
 0x1ee   : > { %p1716_p0 = pnand %p1719_p13, %p1884_p6 }
 0x1f0   : > { %p1717_p1 = pneg %p1716_p0 }
 0x1f2   : > { %1802 = dma.done.wait (%p1717_p1), %s1366_s27, 4096  }
 0x1f3   : > { %1804 = vsyncadd (%p1717_p1), %s1366_s27, 4294963200  ;;  %p12_p2 = scmp.ge.s32.totalorder %s1867_s15, 4   ;;  %s2544_s9 = smov %s1811_s10 }
 0x1f4   : > { %s2545_s10 = smov %s1815_s11  ;;  %s2546_s11 = smov %s1878_s18 }
 0x1f5   : > { %s2547_s12 = smov %s1867_s15  ;;  %14 = sbr.rel (!%p12_p2) target bundleno = 3 (0x3), region = 63 }
 0x1fa   :  { %1371 = vsyncpa [#allocation3], 1 }
 0x1fb   :  { %1373 = vsyncpa [#allocation3 + $0x1], 1 }

</bundles_post_ra>
